<compile_context>
chip_gen: v6e
topology: v6e:2x2x1
jax: 0.10.0
libtpu: 0.0.40
codegen_flags: <defaults>
</compile_context>

<pallas_src>
import functools

import jax
import jax.numpy as jnp
from jax import lax
from jax.experimental import pallas as pl
from jax.experimental.pallas import tpu as pltpu


# -----------------------------------------------------------------------------
# Per-generation VMEM budget / tile helpers
# -----------------------------------------------------------------------------
def _vmem_limit_bytes():
    """Scoped-VMEM limit with headroom: ~48 MiB on v7x (64 MiB physical),
    ~100 MiB on v5e/v6e (128 MiB physical)."""
    cap = 64 << 20
    try:
        info = pltpu.get_tpu_info()
        cap = int(getattr(info, "vmem_capacity_bytes", cap))
    except Exception:
        pass
    return int(max(32 << 20, min(cap - (16 << 20), 100 << 20)))


def _row_tile(m, max_tile):
    """Row tile: multiple of 8 that divides m; else bounded tile + masked
    cdiv-edge block (never fall back to one whole-array block)."""
    if m <= max_tile:
        return m, 1
    tm = (max_tile // 8) * 8
    while tm >= 8 and m % tm:
        tm -= 8
    if tm >= 8:
        return tm, m // tm
    tm = (max_tile // 8) * 8
    return tm, pl.cdiv(m, tm)


def _col_tile(n, max_tile=1024):
    """Lane-axis tile: multiple of 128 that divides n, else full width."""
    if n <= max_tile:
        return n, 1
    tn = (max_tile // 128) * 128
    while tn >= 128 and n % tn:
        tn -= 128
    if tn >= 128:
        return tn, n // tn
    return n, 1


def _pick_time_chunk(s, b, n_src, in_per, h, vmem_limit):
    """Largest time chunk (divisor of S, capped) whose streamed working set
    (double-buffered input/output slabs + gate scratch) fits the budget."""
    weight_bytes = 4 * (n_src * in_per * 4 * h + h * 4 * h + 4 * h)
    budget = max(int(vmem_limit * 0.5) - 2 * weight_bytes, 1 << 20)
    per_t = 4 * b * (2 * n_src * in_per + 2 * h + 4 * h)
    t = int(max(1, min(s, 256, budget // max(per_t, 1))))
    while s % t:
        t -= 1
    return t


# -----------------------------------------------------------------------------
# Kernel 1: row/col-tiled Linear (+ fused LeakyReLU) — input projection.
# -----------------------------------------------------------------------------
def _linear_kernel(x_ref, w_ref, b_ref, o_ref, *, negative_slope):
    x = x_ref[...].astype(jnp.float32)
    w = w_ref[...].astype(jnp.float32)
    y = jnp.dot(x, w, preferred_element_type=jnp.float32)
    y = y + b_ref[...].astype(jnp.float32)
    if negative_slope is not None:
        y = jnp.where(y >= 0.0, y, negative_slope * y)
    o_ref[...] = y.astype(o_ref.dtype)


def pallas_linear(x, w, b, *, negative_slope=None, vmem_limit):
    """x: (M, K), w: (K, N), b: (N,) -> (M, N)."""
    m, k = x.shape
    k2, n = w.shape
    assert k == k2
    max_row = 1024 if vmem_limit >= (80 << 20) else 512
    tm, gm = _row_tile(m, max_row)
    tn, gn = _col_tile(n)
    kernel = functools.partial(_linear_kernel, negative_slope=negative_slope)
    return pl.pallas_call(
        kernel,
        out_shape=jax.ShapeDtypeStruct((m, n), x.dtype),
        grid_spec=pltpu.PrefetchScalarGridSpec(
            num_scalar_prefetch=0,
            grid=(gm, gn),
            in_specs=[
                pl.BlockSpec((tm, k), lambda i, j: (i, 0)),
                pl.BlockSpec((k, tn), lambda i, j: (0, j)),
                pl.BlockSpec((1, tn), lambda i, j: (0, j)),
            ],
            out_specs=pl.BlockSpec((tm, tn), lambda i, j: (i, j)),
        ),
        compiler_params=pltpu.CompilerParams(
            dimension_semantics=("parallel", "parallel"),
            vmem_limit_bytes=vmem_limit,
        ),
    )(x, w, b.reshape(1, n))


# -----------------------------------------------------------------------------
# Kernel 2: fused bidirectional LSTM layer, streamed over time chunks.
#   x_src    : (n_src, S, B, in_per)  time-major layer input
#              (n_src=1 for layer 0, n_src=2 for the (fwd, rev) halves of the
#               previous layer's output — avoids any feature concatenation).
#   w_ih_t   : (2, n_src, in_per, 4H), w_hh_t: (2, H, 4H), bias: (2, 1, 4H)
#              gate columns already permuted to (i, f, o, g).
#   outputs  : out (2, S, B, H), h_n (2, B, H), c_n (2, B, H).
# Grid = (direction, time-chunk); direction is "parallel" (v7x 2 TCs), time is
# "arbitrary" with h/c carried in VMEM scratch across chunks.
# -----------------------------------------------------------------------------
def _bidir_lstm_kernel(x_ref, wih_ref, whh_ref, b_ref,
                       out_ref, hn_ref, cn_ref,
                       h_scr, c_scr, g_scr, *, hidden_dim):
    d = pl.program_id(0)           # 0 = forward, 1 = reverse
    i = pl.program_id(1)           # time-chunk index within this direction
    n_src, t_chunk, b_sz, in_per = x_ref.shape
    hd = hidden_dim
    h4 = 4 * hd

    @pl.when(i == 0)
    def _():
        h_scr[...] = jnp.zeros_like(h_scr)
        c_scr[...] = jnp.zeros_like(c_scr)

    # Chunk-level gate pre-activation: one big MXU matmul per source half.
    bias = b_ref[0].astype(jnp.float32)                      # (1, 4H)
    acc = jnp.zeros((t_chunk * b_sz, h4), jnp.float32) + bias
    for s_idx in range(n_src):
        xs = x_ref[s_idx].astype(jnp.float32).reshape(t_chunk * b_sz, in_per)
        ws = wih_ref[0, s_idx].astype(jnp.float32)           # (in_per, 4H)
        acc = acc + jnp.dot(xs, ws, preferred_element_type=jnp.float32)
    g_scr[...] = acc.reshape(t_chunk, b_sz, h4)

    whh = whh_ref[0].astype(jnp.float32)                     # (H, 4H)

    def step(k, carry):
        # forward walks k, reverse walks t_chunk-1-k (no flips anywhere).
        t = d * (t_chunk - 1 - 2 * k) + k
        h = h_scr[...]
        c = c_scr[...]
        gt = g_scr[t] + jnp.dot(h, whh, preferred_element_type=jnp.float32)
        sig = jax.nn.sigmoid(gt[:, :3 * hd])   # contiguous (i | f | o) slab
        i_g = sig[:, :hd]
        f_g = sig[:, hd:2 * hd]
        o_g = sig[:, 2 * hd:3 * hd]
        g_g = jnp.tanh(gt[:, 3 * hd:])
        c_new = f_g * c + i_g * g_g
        h_new = o_g * jnp.tanh(c_new)
        h_scr[...] = h_new
        c_scr[...] = c_new
        out_ref[0, t] = h_new.astype(out_ref.dtype)
        return carry

    lax.fori_loop(0, t_chunk, step, 0)
    hn_ref[0] = h_scr[...].astype(hn_ref.dtype)
    cn_ref[0] = c_scr[...].astype(cn_ref.dtype)


def pallas_bidir_lstm(x_src, w_ih_t, w_hh_t, bias, *, hidden_dim, vmem_limit):
    n_src, s, b, in_per = x_src.shape
    h = hidden_dim
    h4 = 4 * h
    t_chunk = _pick_time_chunk(s, b, n_src, in_per, h, vmem_limit)
    nc = s // t_chunk

    def tmap(d, i):
        # forward: chunk i; reverse: chunk nc-1-i (pure index arithmetic).
        return d * (nc - 1 - 2 * i) + i

    kernel = functools.partial(_bidir_lstm_kernel, hidden_dim=h)
    out_shape = (
        jax.ShapeDtypeStruct((2, s, b, h), x_src.dtype),
        jax.ShapeDtypeStruct((2, b, h), x_src.dtype),
        jax.ShapeDtypeStruct((2, b, h), x_src.dtype),
    )
    return pl.pallas_call(
        kernel,
        out_shape=out_shape,
        grid_spec=pltpu.PrefetchScalarGridSpec(
            num_scalar_prefetch=0,
            grid=(2, nc),
            in_specs=[
                pl.BlockSpec((n_src, t_chunk, b, in_per),
                             lambda d, i: (0, tmap(d, i), 0, 0)),
                pl.BlockSpec((1, n_src, in_per, h4), lambda d, i: (d, 0, 0, 0)),
                pl.BlockSpec((1, h, h4), lambda d, i: (d, 0, 0)),
                pl.BlockSpec((1, 1, h4), lambda d, i: (d, 0, 0)),
            ],
            out_specs=[
                pl.BlockSpec((1, t_chunk, b, h),
                             lambda d, i: (d, tmap(d, i), 0, 0)),
                pl.BlockSpec((1, b, h), lambda d, i: (d, 0, 0)),
                pl.BlockSpec((1, b, h), lambda d, i: (d, 0, 0)),
            ],
            scratch_shapes=[
                pltpu.VMEM((b, h), jnp.float32),        # running h
                pltpu.VMEM((b, h), jnp.float32),        # running c
                pltpu.VMEM((t_chunk, b, h4), jnp.float32),  # chunk gates
            ],
        ),
        compiler_params=pltpu.CompilerParams(
            dimension_semantics=("parallel", "arbitrary"),
            vmem_limit_bytes=vmem_limit,
        ),
    )(x_src, w_ih_t, w_hh_t, bias)


# -----------------------------------------------------------------------------
# Kernel 3: LayerNorm over the 2H concat feature, operating directly on the
# (2, S, B, H) direction-split layout (no concat needed).
# -----------------------------------------------------------------------------
def _layer_norm_bidir_kernel(x_ref, g_ref, b_ref, o_ref, *, eps):
    x = x_ref[...].astype(jnp.float32)                 # (2, TS, B, H)
    n_feat = x.shape[0] * x.shape[-1]                  # = 2H
    s_lane = jnp.sum(x, axis=-1, keepdims=True)
    mean = jnp.sum(s_lane, axis=0, keepdims=True) / n_feat
    xc = x - mean
    v_lane = jnp.sum(xc * xc, axis=-1, keepdims=True)
    var = jnp.sum(v_lane, axis=0, keepdims=True) / n_feat
    y = xc * lax.rsqrt(var + eps)
    y = y * g_ref[...].astype(jnp.float32) + b_ref[...].astype(jnp.float32)
    o_ref[...] = y.astype(o_ref.dtype)


def pallas_layer_norm_bidir(x, gamma, beta, *, eps=1e-5, vmem_limit):
    two, s, b, h = x.shape
    per_s = 4 * 2 * b * h * 4
    budget = max(int(vmem_limit * 0.5), 1 << 20)
    ts = int(max(1, min(s, budget // max(per_s, 1))))
    while s % ts:
        ts -= 1
    gs = s // ts
    kernel = functools.partial(_layer_norm_bidir_kernel, eps=eps)
    return pl.pallas_call(
        kernel,
        out_shape=jax.ShapeDtypeStruct((2, s, b, h), x.dtype),
        grid_spec=pltpu.PrefetchScalarGridSpec(
            num_scalar_prefetch=0,
            grid=(gs,),
            in_specs=[
                pl.BlockSpec((2, ts, b, h), lambda i: (0, i, 0, 0)),
                pl.BlockSpec((2, 1, 1, h), lambda i: (0, 0, 0, 0)),
                pl.BlockSpec((2, 1, 1, h), lambda i: (0, 0, 0, 0)),
            ],
            out_specs=pl.BlockSpec((2, ts, b, h), lambda i: (0, i, 0, 0)),
        ),
        compiler_params=pltpu.CompilerParams(
            dimension_semantics=("parallel",),
            vmem_limit_bytes=vmem_limit,
        ),
    )(x, gamma.reshape(2, 1, 1, h), beta.reshape(2, 1, 1, h))


# -----------------------------------------------------------------------------
# Parameter prep: permute gate columns (i,f,g,o) -> (i,f,o,g), transpose, and
# stack the two directions (done once, outside the kernels).
# -----------------------------------------------------------------------------
def _reorder_gates(w):
    h4 = w.shape[0]
    h = h4 // 4
    return jnp.concatenate([w[:2 * h], w[3 * h:], w[2 * h:3 * h]], axis=0)


def _prep_layer(lstm_params, layer, n_src, in_per, hidden_dim):
    h4 = 4 * hidden_dim
    wih_l, whh_l, b_l = [], [], []
    for direction in range(2):
        w_ih, w_hh, b_ih, b_hh = lstm_params[(layer, direction)]
        assert w_ih.shape[1] == n_src * in_per
        w_ih_r = _reorder_gates(w_ih)            # (4H, n_src*in_per)
        w_hh_r = _reorder_gates(w_hh)            # (4H, H)
        b_r = _reorder_gates(b_ih + b_hh)        # (4H,)
        wih_l.append(w_ih_r.T.reshape(n_src, in_per, h4))
        whh_l.append(w_hh_r.T)
        b_l.append(b_r.reshape(1, h4))
    # TODO(synk): optionally cast these to bf16 for the MXU (f32 accumulation
    # kept) to halve weight VMEM/HBM traffic; left in f32 for exact numerics.
    return jnp.stack(wih_l, 0), jnp.stack(whh_l, 0), jnp.stack(b_l, 0)


# -----------------------------------------------------------------------------
# Full LSTMEncoder forward (inference mode)
# -----------------------------------------------------------------------------
def lstm_encoder_forward(params, x, *, num_layers, hidden_dim):
    b, s, in_dim = x.shape
    vmem_limit = _vmem_limit_bytes()

    # Single transpose of the raw input to time-major; everything downstream
    # stays (·, S, B, ·) until the final output transpose.
    x_sb = jnp.transpose(x, (1, 0, 2))                          # (S, B, In)

    # 1) input projection + LeakyReLU(0.01), fused in one Pallas matmul.
    proj = pallas_linear(
        x_sb.reshape(s * b, in_dim), params["proj_w"].T, params["proj_b"],
        negative_slope=0.01, vmem_limit=vmem_limit,
    )
    x_proj = proj.reshape(s, b, hidden_dim)
    # TODO(synk): the PyTorch NaN -> reset_parameters() recovery after the
    # projection is a training-time random re-init side effect; no in-graph
    # Pallas equivalent, skipped.

    # 2) num_layers x fused bidirectional LSTM, h0 = c0 = 0.
    #    Inter-layer dropout is identity in eval mode and is omitted.
    layer_in = x_proj[None]                                     # (1, S, B, H)
    h_finals, c_finals = [], []
    for layer in range(num_layers):
        n_src = layer_in.shape[0]
        in_per = layer_in.shape[-1]
        wih_all, whh_all, bias_all = _prep_layer(
            params["lstm"], layer, n_src, in_per, hidden_dim)
        layer_out, h_n, c_n = pallas_bidir_lstm(
            layer_in, wih_all, whh_all, bias_all,
            hidden_dim=hidden_dim, vmem_limit=vmem_limit)
        h_finals.append(h_n)
        c_finals.append(c_n)
        layer_in = layer_out                                    # (2, S, B, H)

    hidden = jnp.concatenate(h_finals, axis=0)   # (num_layers*2, B, H)
    cell = jnp.concatenate(c_finals, axis=0)

    # 3) LayerNorm over the 2H feature (direction-split layout, no concat).
    normed = pallas_layer_norm_bidir(
        layer_in, params["ln_g"], params["ln_b"], vmem_limit=vmem_limit)

    # Back to the module's (B, S, 2H) output layout (single relayout pass).
    lstm_out = jnp.transpose(normed, (2, 1, 0, 3)).reshape(b, s, 2 * hidden_dim)

    # 4) Global "any NaN anywhere -> skip connection x.repeat(1,1,2)" at the
    #    wrapper level so the global semantics survive kernel tiling.
    xp_bs = jnp.transpose(x_proj, (1, 0, 2))                    # (B, S, H)
    skip = jnp.concatenate([xp_bs, xp_bs], axis=-1)
    lstm_out = jnp.where(jnp.any(jnp.isnan(lstm_out)), skip, lstm_out)

    return lstm_out, (hidden, cell)


# -----------------------------------------------------------------------------
# Parameter init (mirrors _init_weights: xavier_uniform proj, orthogonal LSTM,
# zero biases, default LayerNorm affine).
# -----------------------------------------------------------------------------
def _orthogonal(key, shape):
    rows, cols = shape
    n = max(rows, cols)
    a = jax.random.normal(key, (n, n), dtype=jnp.float32)
    q, r = jnp.linalg.qr(a)
    d = jnp.diag(r)
    q = q * jnp.where(d >= 0, 1.0, -1.0)[None, :]
    return q[:rows, :cols].astype(jnp.float32)


def init_params(key, input_dim, hidden_dim, num_layers):
    keys = jax.random.split(key, 1 + num_layers * 2 * 2)
    limit = (6.0 / (input_dim + hidden_dim)) ** 0.5
    proj_w = jax.random.uniform(
        keys[0], (hidden_dim, input_dim), jnp.float32, -limit, limit)
    proj_b = jnp.zeros((hidden_dim,), jnp.float32)
    lstm = {}
    ki = 1
    for layer in range(num_layers):
        in_dim = hidden_dim if layer == 0 else 2 * hidden_dim
        for direction in range(2):
            w_ih = _orthogonal(keys[ki], (4 * hidden_dim, in_dim)); ki += 1
            w_hh = _orthogonal(keys[ki], (4 * hidden_dim, hidden_dim)); ki += 1
            b_ih = jnp.zeros((4 * hidden_dim,), jnp.float32)
            b_hh = jnp.zeros((4 * hidden_dim,), jnp.float32)
            lstm[(layer, direction)] = (w_ih, w_hh, b_ih, b_hh)
    return {
        "proj_w": proj_w,
        "proj_b": proj_b,
        "lstm": lstm,
        "ln_g": jnp.ones((2 * hidden_dim,), jnp.float32),
        "ln_b": jnp.zeros((2 * hidden_dim,), jnp.float32),
    }


# -----------------------------------------------------------------------------
# Pure-JAX reference (PyTorch gate order, lax.scan recurrence) for checking.
# -----------------------------------------------------------------------------
def reference_forward(params, x, *, num_layers, hidden_dim):
    b, s, _ = x.shape
    xp = x @ params["proj_w"].T + params["proj_b"]
    xp = jnp.where(xp >= 0, xp, 0.01 * xp)
    layer_in = xp
    h_finals, c_finals = [], []
    for layer in range(num_layers):
        outs = []
        for direction in range(2):
            w_ih, w_hh, b_ih, b_hh = params["lstm"][(layer, direction)]
            inp = layer_in if direction == 0 else jnp.flip(layer_in, axis=1)

            def step(carry, x_t, w_ih=w_ih, w_hh=w_hh, b_ih=b_ih, b_hh=b_hh):
                h, c = carry
                g = x_t @ w_ih.T + b_ih + h @ w_hh.T + b_hh
                i = jax.nn.sigmoid(g[:, :hidden_dim])
                f = jax.nn.sigmoid(g[:, hidden_dim:2 * hidden_dim])
                gg = jnp.tanh(g[:, 2 * hidden_dim:3 * hidden_dim])
                o = jax.nn.sigmoid(g[:, 3 * hidden_dim:])
                c = f * c + i * gg
                h = o * jnp.tanh(c)
                return (h, c), h

            init = (jnp.zeros((b, hidden_dim), jnp.float32),
                    jnp.zeros((b, hidden_dim), jnp.float32))
            (h_n, c_n), ys = lax.scan(step, init, jnp.transpose(inp, (1, 0, 2)))
            out = jnp.transpose(ys, (1, 0, 2))
            if direction == 1:
                out = jnp.flip(out, axis=1)
            outs.append(out)
            h_finals.append(h_n)
            c_finals.append(c_n)
        layer_in = jnp.concatenate(outs, axis=-1)
    hidden = jnp.stack(h_finals, axis=0)
    cell = jnp.stack(c_finals, axis=0)
    mean = jnp.mean(layer_in, axis=-1, keepdims=True)
    var = jnp.mean((layer_in - mean) ** 2, axis=-1, keepdims=True)
    normed = (layer_in - mean) * lax.rsqrt(var + 1e-5) * params["ln_g"] + params["ln_b"]
    skip = jnp.concatenate([xp, xp], axis=-1)
    out = jnp.where(jnp.any(jnp.isnan(normed)), skip, normed)
    return out, (hidden, cell)


if __name__ == "__main__":
    batch, seq, input_dim, hidden_dim, num_layers = 2, 8, 16, 32, 3
    key = jax.random.PRNGKey(0)
    kx, kp = jax.random.split(key)
    x = jax.random.normal(kx, (batch, seq, input_dim), dtype=jnp.float32)
    params = init_params(kp, input_dim, hidden_dim, num_layers)

    out, (hidden, cell) = lstm_encoder_forward(
        params, x, num_layers=num_layers, hidden_dim=hidden_dim)
    out = jax.block_until_ready(out)

    assert out.shape == (batch, seq, 2 * hidden_dim), out.shape
    assert hidden.shape == (num_layers * 2, batch, hidden_dim), hidden.shape
    assert cell.shape == (num_layers * 2, batch, hidden_dim), cell.shape

    ref_out, (ref_h, ref_c) = reference_forward(
        params, x, num_layers=num_layers, hidden_dim=hidden_dim)
    assert jnp.allclose(out, ref_out, atol=1e-3, rtol=1e-3), "output mismatch"
    assert jnp.allclose(hidden, ref_h, atol=1e-3, rtol=1e-3), "hidden mismatch"
    assert jnp.allclose(cell, ref_c, atol=1e-3, rtol=1e-3), "cell mismatch"

    print("KERNEL_OK")
</pallas_src>

<mosaic_0001>
module attributes {stable_mosaic.version = 11 : i64} {
  func.func @_linear_kernel(%arg0: i32, %arg1: i32, %arg2: memref<16x16xf32, #tpu.memory_space<vmem>>, %arg3: memref<16x32xf32, #tpu.memory_space<vmem>>, %arg4: memref<1x32xf32, #tpu.memory_space<vmem>>, %arg5: memref<16x32xf32, #tpu.memory_space<vmem>>) attributes {dimension_semantics = [#tpu.dimension_semantics<parallel>, #tpu.dimension_semantics<parallel>], iteration_bounds = array<i64: 1, 1>, scalar_prefetch = 0 : i64, scratch_operands = 0 : i64, tpu.core_type = #tpu.core_type<tc>, window_params = [{transform_indices = @transform_0, window_bounds = array<i64: 16, 16>}, {transform_indices = @transform_1, window_bounds = array<i64: 16, 32>}, {transform_indices = @transform_2, window_bounds = array<i64: 1, 32>}, {transform_indices = @transform_3, window_bounds = array<i64: 16, 32>}]} {
    %c0 = arith.constant 0 : index
    %c0_0 = arith.constant 0 : index
    %0 = vector.load %arg2[%c0, %c0_0] : memref<16x16xf32, #tpu.memory_space<vmem>>, vector<16x16xf32>
    %c0_1 = arith.constant 0 : index
    %c0_2 = arith.constant 0 : index
    %1 = vector.load %arg3[%c0_1, %c0_2] : memref<16x32xf32, #tpu.memory_space<vmem>>, vector<16x32xf32>
    %cst = arith.constant dense<0.000000e+00> : vector<16x32xf32>
    %2 = tpu.matmul %0, %1, %cst {dimension_numbers = #tpu.dot_dimension_numbers<[1], [0], [0], [1], [0, 0, 1, 1], [], []>} : vector<16x16xf32>, vector<16x32xf32>, vector<16x32xf32> -> vector<16x32xf32>
    %c0_3 = arith.constant 0 : index
    %c0_4 = arith.constant 0 : index
    %3 = vector.load %arg4[%c0_3, %c0_4] : memref<1x32xf32, #tpu.memory_space<vmem>>, vector<1x32xf32>
    %4 = vector.broadcast %3 : vector<1x32xf32> to vector<16x32xf32>
    %5 = arith.addf %2, %4 : vector<16x32xf32>
    %cst_5 = arith.constant 0.000000e+00 : f32
    %6 = vector.broadcast %cst_5 : f32 to vector<16x32xf32>
    %7 = arith.cmpf oge, %5, %6 : vector<16x32xf32>
    %cst_6 = arith.constant 0.00999999977 : f32
    %8 = vector.broadcast %cst_6 : f32 to vector<16x32xf32>
    %9 = arith.mulf %8, %5 : vector<16x32xf32>
    %10 = arith.select %7, %5, %9 : vector<16x32xi1>, vector<16x32xf32>
    %c0_7 = arith.constant 0 : index
    %c0_8 = arith.constant 0 : index
    %11 = vector.load %arg5[%c0_7, %c0_8] : memref<16x32xf32, #tpu.memory_space<vmem>>, vector<16x32xf32>
    tpu.vector_store %arg5[%c0_7, %c0_8], %10 {strides = array<i32>} : memref<16x32xf32, #tpu.memory_space<vmem>>, vector<16x32xf32>,
    return
  }
  func.func @transform_0(%arg0: i32, %arg1: i32) -> (i32, i32) {
    %c0_i32 = arith.constant 0 : i32
    %c0_i32_0 = arith.constant 0 : i32
    return %arg0, %c0_i32 : i32, i32
  }
  func.func @transform_1(%arg0: i32, %arg1: i32) -> (i32, i32) {
    %c0_i32 = arith.constant 0 : i32
    %c0_i32_0 = arith.constant 0 : i32
    return %c0_i32, %arg1 : i32, i32
  }
  func.func @transform_2(%arg0: i32, %arg1: i32) -> (i32, i32) {
    %c0_i32 = arith.constant 0 : i32
    %c0_i32_0 = arith.constant 0 : i32
    return %c0_i32, %arg1 : i32, i32
  }
  func.func @transform_3(%arg0: i32, %arg1: i32) -> (i32, i32) {
    %c0_i32 = arith.constant 0 : i32
    return %arg0, %arg1 : i32, i32
  }
}

</mosaic_0001>

<bundles_post_ra>
// kernel: tpu_custom_call.1
= control target key start
LH: loop header
LB: loop body
LE: loop exit
PB: predicated region body
PF: predicated region fallthrough
CT: control target
= control target key end

     0   :  { %8 = vsyncpa [#allocation3], 0  ;;  %s294_s0 = inlined_call_operand.hbm [shape: f32[16,16], index: 0, kind: input, shape index: {}]   ;;  %s295_s1 = inlined_call_operand.hbm [shape: f32[16,32], index: 1, kind: input, shape index: {}]   ;;  %s296_s2 = inlined_call_operand.vmem [shape: f32[1,32], index: 2, kind: input, shape index: {}]   ;;  %s297_s3 = inlined_call_operand.hbm [shape: f32[16,32], index: 3, kind: output, shape index: {}]  }
   0x1   :  { %9 = vsyncpa [#allocation6], 0 }
   0x2   :  { %10 = vsyncpa [#allocation4], 0  ;;  %s248_s12 = smov [#allocation2]  }
   0x3   :  { %s16_s13 = sshll.u32 %s248_s12, 4  ;;  %s17_s13 = int_to_ptr.vmem [resolvable:$true] %s16_s13 }
   0x4   :  { %s190_s14 = scalar_lea.vmem %s17_s13, 256  ;;  %p195_p1 = scmp.lt.s32.totalorder %s17_s13, %s17_s13 }
   0x5   :  { %p191_p0 = scmp.ne.s32.totalorder %s17_s13, %s190_s14  ;;  %p196_p2 = scmp.lt.s32.totalorder %s190_s14, %s190_s14 }
   0x7   :  { %p197_p3 = por %p196_p2, %p195_p1 }
   0x9   :  { %p198_p4 = pnand %p197_p3, %p191_p0 }
   0xb   :  { %201 = shalt.err (!%p198_p4)
}
   0xc   :  { %s249_s15 = smov 128   ;;  %s250_s16 = smov 8  }
   0xd   :  { %22 = dma.hbm_to_vmem [thread:$0]  %s294_s0, 256, %s17_s13, [#allocation3], %s249_s15, %s249_s15, %s250_s16  }
   0xe   :  { %s251_s19 = smov [#allocation5]  }
   0xf   :  { %s28_s20 = sshll.u32 %s251_s19, 4  ;;  %s29_s20 = int_to_ptr.vmem [resolvable:$true] %s28_s20 }
  0x10   :  { %s210_s21 = scalar_lea.vmem %s29_s20, 256  ;;  %p215_p6 = scmp.lt.s32.totalorder %s29_s20, %s29_s20 }
  0x11   :  { %p211_p5 = scmp.ne.s32.totalorder %s29_s20, %s210_s21  ;;  %p216_p7 = scmp.lt.s32.totalorder %s210_s21, %s210_s21 }
  0x13   :  { %p217_p8 = por %p216_p7, %p215_p6 }
  0x15   :  { %p218_p9 = pnand %p217_p8, %p211_p5 }
  0x17   :  { %221 = shalt.err (!%p218_p9)
}
  0x18   :  { %34 = dma.hbm_to_vmem [thread:$0]  %s295_s1, 256, %s29_s20, [#allocation6], %s249_s15, %s249_s15, %s250_s16  }
  0x19   :  { %242 = dma.done.wait [#allocation3], 256  }
  0x1a   :  { %243 = vsyncadd [#allocation3], 4294967040 }
  0x1b   :  { %244 = dma.done.wait [#allocation6], 256  }
  0x1c   :  { %245 = vsyncadd [#allocation6], 4294967040  ;;  %vm54_vm0 = vcmask 130048   ;;  %v46_v0 = vld [vmem:[#allocation5 + $0x8] sm:$0xff]  ;;  %v45_v1 = vld [vmem:[#allocation5] sm:$0xff]  ;;  %vm142_vm2 = vcmask 261120  }
  0x1d   :  { %v43_v2 = vld [vmem:[#allocation2] sm:$0xff]  ;;  %170 = vmatprep.subr.mxu0 %v46_v0  ;;  %v44_v3 = vld [vmem:[#allocation2 + $0x8] sm:$0xff]  ;;  %s252_s1 = smov [#allocation7]  }
  0x1e   :  { %174 = vmatprep.mubr.msk.f32.mxu0 %vm54_vm0, %v43_v2  ;;  %171 = vmatpush3.msra.mxu0 %v46_v0  ;;  %v163_v4 = vld [vmem:[%s296_s2] ss:$0 sm:$0xff]  ;;  %s150_s25 = sshll.u32 %s252_s1, 4  ;;  %s151_s25 = int_to_ptr.vmem [resolvable:$true] %s150_s25 }
  0x1f   :  { %172 = vmatprep.subr.mxu0 %v45_v1  ;;  %s222_s26 = scalar_lea.vmem %s151_s25, 256  ;;  %p227_p11 = scmp.lt.s32.totalorder %s151_s25, %s151_s25 }
  0x20   :  { %173 = vmatpush3.msra.mxu0 %v45_v1  ;;  %p223_p10 = scmp.ne.s32.totalorder %s151_s25, %s222_s26  ;;  %p228_p12 = scmp.lt.s32.totalorder %s222_s26, %s222_s26 }
  0x21   :  { %175 = vmatmul.mubr.msk.f32.vlgmr.msra.gmra.mxu0 %vm54_vm0, %v44_v3 }
  0x22   :  { %p229_p13 = por %p228_p12, %p227_p11 }
  0x24   :  { %p230_p0 = pnand %p229_p13, %p223_p10 }
  0xe1   :  { %v176_v5 = vpop.f32.mrf.mxu0 }
  0xe2   :  { %v133_v6 = vadd.f32 %v176_v5, %v163_v4 }
  0xe3   :  { %v127_v7 = vpop.f32.mrf.mxu0 }
  0xe4   :  { %vm137_vm1 = vcmp.ge.f32.partialorder %v133_v6, 0.0  ;;  %v139_v8 = vmul.f32 0.01, %v133_v6  ;;  %v128_v9 = vadd.f32 %v163_v4, %v127_v7 }
  0xe6   :  { %v141_v10 = vsel %vm137_vm1, %v133_v6, %v139_v8  ;;  %vm136_vm3 = vcmp.ge.f32.partialorder %v128_v9, 0.0  ;;  %v138_v11 = vmul.f32 0.01, %v128_v9 }
  0xe7   :  { %144 = vst.msk [vmem:[#allocation7 + $0x8] sm:$0xff] %vm142_vm2, %v141_v10 }
  0xe8   :  { %v140_v12 = vsel %vm136_vm3, %v128_v9, %v138_v11 }
  0xe9   :  { %143 = vst.msk [vmem:[#allocation7] sm:$0xff] %vm142_vm2, %v140_v12 }
  0xea   :  { %233 = shalt.err (!%p230_p0)
}
  0xeb   :  { %156 = dma.vmem_to_hbm [thread:$0]  %s151_s25, 256, %s297_s3, [#allocation4], %s249_s15, %s249_s15, %s250_s16  }
  0xec   :  { %246 = dma.done.wait [#allocation4], 256  }
  0xed   :  { %247 = vsyncadd [#allocation4], 4294967040 }
  0xee   :  { %160 = vsyncpa [#allocation3], 1 }
  0xef   :  { %161 = vsyncpa [#allocation6], 1 }
  0xf0   :  { %162 = vsyncpa [#allocation4], 1 }

</bundles_post_ra>
